<compile_context>
chip_gen: v7x
topology: tpu7x:2x2x1
jax: 0.10.0
libtpu: 0.0.40
codegen_flags: <defaults>
</compile_context>

<pallas_src>
import math

import jax
import jax.numpy as jnp
from jax.experimental import pallas as pl
from jax.experimental.pallas import tpu as pltpu


def _linear_gated_kernel(x_ref, pot_ref, tresh_ref, decay_ref, act_ref, png_ref):
    # x_ref / pot_ref / act_ref / png_ref : [TB, L] VMEM tiles
    # tresh_ref / decay_ref               : [1, L]  (broadcast over rows)
    potential = pot_ref[...] + x_ref[...]
    mask = potential > tresh_ref[...]                      # relu(p - t) != 0  <=>  p > t
    zero = jnp.zeros((), dtype=potential.dtype)
    act_ref[...] = jnp.where(mask, potential, zero).astype(act_ref.dtype)
    png_ref[...] = jnp.where(mask, zero, potential * decay_ref[...]).astype(png_ref.dtype)


def linear_gated_forward(x, potential, tresh, decay_rate, *, block_rows=1024):
    """x, potential: [B, num_out]; tresh, decay_rate: [num_out]."""
    B, N = x.shape

    # ---- lane-density fold: make the last dim a multiple of 128 if possible ----
    rep = 1
    L = N
    if N % 128 != 0:
        lcm = (N * 128) // math.gcd(N, 128)
        if (B * N) % lcm == 0:
            L = lcm
            rep = L // N

    if rep > 1:
        R = (B * N) // L
        x2 = x.reshape(R, L)
        pot2 = potential.reshape(R, L)
        tresh2 = jnp.tile(tresh, rep).reshape(1, L)
        decay2 = jnp.tile(decay_rate, rep).reshape(1, L)
    else:
        R = B
        x2 = x
        pot2 = potential
        tresh2 = tresh.reshape(1, N)
        decay2 = decay_rate.reshape(1, N)

    # ---- row tiling over the (folded) batch dimension ----
    if R <= block_rows:
        TB = R                       # full extent -> always legal block shape
    else:
        TB = block_rows              # multiple of 8; ragged tail handled by Pallas

    grid = (pl.cdiv(R, TB),)

    row_spec = pl.BlockSpec((TB, L), lambda i: (i, 0))
    param_spec = pl.BlockSpec((1, L), lambda i: (0, 0))

    out_shapes = (
        jax.ShapeDtypeStruct((R, L), x.dtype),
        jax.ShapeDtypeStruct((R, L), x.dtype),
    )

    activated2, png2 = pl.pallas_call(
        _linear_gated_kernel,
        out_shape=out_shapes,
        grid=grid,
        in_specs=[row_spec, row_spec, param_spec, param_spec],
        out_specs=[row_spec, row_spec],
        compiler_params=pltpu.CompilerParams(
            dimension_semantics=("parallel",)),
    )(x2, pot2, tresh2, decay2)

    if rep > 1:
        activated2 = activated2.reshape(B, N)
        png2 = png2.reshape(B, N)
    return activated2, png2


def linear_gated_reference(x, potential, tresh, decay_rate):
    potential = potential + x
    treshed = potential - tresh[None, :]
    gated = jnp.maximum(treshed, 0.0)
    gated_bool = jnp.where(gated != 0.0, 1.0, 0.0)
    activated = gated_bool * potential
    non_gated_bool = jnp.where(gated == 0.0, 1.0, 0.0)
    non_gated = potential * non_gated_bool
    return activated, non_gated * decay_rate[None, :]


if __name__ == "__main__":
    key = jax.random.PRNGKey(0)
    k_x, k_pot, k_tresh, k_decay = jax.random.split(key, 4)

    batch_size = 4
    num_out = 32

    # Deterministic "parameters" matching the PyTorch __init__ distributions:
    #   tresh      = |U(0,1)| * 0.3 + 0.0
    #   decay_rate = |U(0,1)| * 0.7 + 0.1
    tresh = jnp.abs(jax.random.uniform(k_tresh, (num_out,), jnp.float32)) * 0.3 + 0.0
    decay_rate = jnp.abs(jax.random.uniform(k_decay, (num_out,), jnp.float32)) * 0.7 + 0.1

    x = jax.random.normal(k_x, (batch_size, num_out), jnp.float32)
    potential = jax.random.normal(k_pot, (batch_size, num_out), jnp.float32)

    activated, potential_non_gated = linear_gated_forward(
        x, potential, tresh, decay_rate)
    jax.block_until_ready((activated, potential_non_gated))

    ref_act, ref_png = linear_gated_reference(x, potential, tresh, decay_rate)
    assert jnp.allclose(activated, ref_act, atol=1e-6), "activated mismatch"
    assert jnp.allclose(potential_non_gated, ref_png, atol=1e-6), "png mismatch"

    print("KERNEL_OK")
</pallas_src>

<mosaic_0001>
module attributes {stable_mosaic.version = 11 : i64} {
  func.func @_linear_gated_kernel(%arg0: i32, %arg1: memref<1x128xf32, #tpu.memory_space<vmem>>, %arg2: memref<1x128xf32, #tpu.memory_space<vmem>>, %arg3: memref<1x128xf32, #tpu.memory_space<vmem>>, %arg4: memref<1x128xf32, #tpu.memory_space<vmem>>, %arg5: memref<1x128xf32, #tpu.memory_space<vmem>>, %arg6: memref<1x128xf32, #tpu.memory_space<vmem>>) attributes {dimension_semantics = [#tpu.dimension_semantics<parallel>], iteration_bounds = array<i64: 1>, scalar_prefetch = 0 : i64, scratch_operands = 0 : i64, tpu.core_type = #tpu.core_type<tc>, window_params = [{transform_indices = @transform_0, window_bounds = array<i64: 1, 128>}, {transform_indices = @transform_1, window_bounds = array<i64: 1, 128>}, {pipeline_mode = #tpu.pipeline_mode<synchronous>, transform_indices = @transform_2, window_bounds = array<i64: 1, 128>}, {pipeline_mode = #tpu.pipeline_mode<synchronous>, transform_indices = @transform_3, window_bounds = array<i64: 1, 128>}, {transform_indices = @transform_4, window_bounds = array<i64: 1, 128>}, {transform_indices = @transform_5, window_bounds = array<i64: 1, 128>}]} {
    %c0 = arith.constant 0 : index
    %c0_0 = arith.constant 0 : index
    %0 = vector.load %arg2[%c0, %c0_0] : memref<1x128xf32, #tpu.memory_space<vmem>>, vector<1x128xf32>
    %c0_1 = arith.constant 0 : index
    %c0_2 = arith.constant 0 : index
    %1 = vector.load %arg1[%c0_1, %c0_2] : memref<1x128xf32, #tpu.memory_space<vmem>>, vector<1x128xf32>
    %2 = arith.addf %0, %1 : vector<1x128xf32>
    %c0_3 = arith.constant 0 : index
    %c0_4 = arith.constant 0 : index
    %3 = vector.load %arg3[%c0_3, %c0_4] : memref<1x128xf32, #tpu.memory_space<vmem>>, vector<1x128xf32>
    %4 = arith.cmpf ogt, %2, %3 : vector<1x128xf32>
    %cst = arith.constant 0.000000e+00 : f32
    %5 = vector.broadcast %cst : f32 to vector<1x128xf32>
    %6 = arith.select %4, %2, %5 : vector<1x128xi1>, vector<1x128xf32>
    %c0_5 = arith.constant 0 : index
    %c0_6 = arith.constant 0 : index
    %7 = vector.load %arg5[%c0_5, %c0_6] : memref<1x128xf32, #tpu.memory_space<vmem>>, vector<1x128xf32>
    tpu.vector_store %arg5[%c0_5, %c0_6], %6 {strides = array<i32>} : memref<1x128xf32, #tpu.memory_space<vmem>>, vector<1x128xf32>,
    %c0_7 = arith.constant 0 : index
    %c0_8 = arith.constant 0 : index
    %8 = vector.load %arg4[%c0_7, %c0_8] : memref<1x128xf32, #tpu.memory_space<vmem>>, vector<1x128xf32>
    %9 = arith.mulf %2, %8 : vector<1x128xf32>
    %cst_9 = arith.constant 0.000000e+00 : f32
    %10 = vector.broadcast %cst_9 : f32 to vector<1x128xf32>
    %11 = arith.select %4, %10, %9 : vector<1x128xi1>, vector<1x128xf32>
    %c0_10 = arith.constant 0 : index
    %c0_11 = arith.constant 0 : index
    %12 = vector.load %arg6[%c0_10, %c0_11] : memref<1x128xf32, #tpu.memory_space<vmem>>, vector<1x128xf32>
    tpu.vector_store %arg6[%c0_10, %c0_11], %11 {strides = array<i32>} : memref<1x128xf32, #tpu.memory_space<vmem>>, vector<1x128xf32>,
    return
  }
  func.func @transform_0(%arg0: i32) -> (i32, i32) {
    %c0_i32 = arith.constant 0 : i32
    %c0_i32_0 = arith.constant 0 : i32
    return %arg0, %c0_i32 : i32, i32
  }
  func.func @transform_1(%arg0: i32) -> (i32, i32) {
    %c0_i32 = arith.constant 0 : i32
    %c0_i32_0 = arith.constant 0 : i32
    return %arg0, %c0_i32 : i32, i32
  }
  func.func @transform_2(%arg0: i32) -> (i32, i32) {
    %c0_i32 = arith.constant 0 : i32
    %c0_i32_0 = arith.constant 0 : i32
    %c0_i32_1 = arith.constant 0 : i32
    return %c0_i32, %c0_i32_0 : i32, i32
  }
  func.func @transform_3(%arg0: i32) -> (i32, i32) {
    %c0_i32 = arith.constant 0 : i32
    %c0_i32_0 = arith.constant 0 : i32
    %c0_i32_1 = arith.constant 0 : i32
    return %c0_i32, %c0_i32_0 : i32, i32
  }
  func.func @transform_4(%arg0: i32) -> (i32, i32) {
    %c0_i32 = arith.constant 0 : i32
    %c0_i32_0 = arith.constant 0 : i32
    return %arg0, %c0_i32 : i32, i32
  }
  func.func @transform_5(%arg0: i32) -> (i32, i32) {
    %c0_i32 = arith.constant 0 : i32
    %c0_i32_0 = arith.constant 0 : i32
    return %arg0, %c0_i32 : i32, i32
  }
}

</mosaic_0001>

<bundles_post_ra>
// kernel: tpu_custom_call.1
= control target key start
LH: loop header
LB: loop body
LE: loop exit
PB: predicated region body
PF: predicated region fallthrough
CT: control target
= control target key end

     0   :  { %11 = vsyncpa [#allocation3], 0  ;;  %s234_s0 = inlined_call_operand.hbm [shape: f32[1,128], index: 0, kind: input, shape index: {}]   ;;  %s235_s1 = inlined_call_operand.vmem [shape: f32[1,128], index: 1, kind: input, shape index: {}]   ;;  %s236_s2 = inlined_call_operand.vmem [shape: f32[1,128], index: 2, kind: input, shape index: {}]   ;;  %s237_s3 = inlined_call_operand.vmem [shape: f32[1,128], index: 3, kind: input, shape index: {}]   ;;  %s238_s4 = inlined_call_operand.hbm [shape: f32[1,128], index: 4, kind: output, shape index: {0}]   ;;  %s239_s5 = inlined_call_operand.hbm [shape: f32[1,128], index: 5, kind: output, shape index: {1}]  }
   0x1   :  { %12 = vsyncpa [#allocation4], 0 }
   0x2   :  { %13 = vsyncpa [#allocation7], 0  ;;  %s148_s18 = smov [#allocation2]   ;;  %s76_s22 = scalar_lea.hbm %s234_s0, 16 }
   0x3   :  { %s20_s19 = sshll.u32 %s148_s18, 4  ;;  %p77_p0 = scmp.ne.s32.totalorder %s234_s0, %s76_s22  ;;  %s21_s19 = int_to_ptr.vmem [resolvable:$true] %s20_s19 }
   0x4   :  { %p80_p1 = scmp.lt.u32.totalorder %s76_s22, %s234_s0 }
   0x6   :  { %p82_p2 = pnand %p80_p1, %p77_p0 }
   0x8   :  { %85 = shalt.err (!%p82_p2)
}
   0x9   :  { %s86_s27 = scalar_lea.vmem %s21_s19, 16  ;;  %s90_s28 = scalar_lea.vmem %s21_s19, 32 }
   0xa   :  { %p87_p3 = scmp.ne.s32.totalorder %s21_s19, %s86_s27  ;;  %p91_p4 = scmp.lt.s32.totalorder %s21_s19, %s21_s19 }
   0xb   :  { %p92_p5 = scmp.lt.s32.totalorder %s90_s28, %s86_s27 }
   0xd   :  { %p93_p6 = por %p92_p5, %p91_p4 }
   0xf   :  { %p94_p7 = pnand %p93_p6, %p87_p3 }
  0x11   :  { %97 = shalt.err (!%p94_p7)
}
  0x12   :  { %23 = dma.hbm_to_vmem [thread:$0]  %s234_s0, 16, %s21_s19, [#allocation3]  }
  0x13   :  { %142 = dma.done.wait [#allocation3], 16  }
  0x14   :  { %143 = vsyncadd [#allocation3], 4294967280  ;;  %s149_s6 = smov [#allocation5]   ;;  %v33_v0 = vld [vmem:[%s235_s1] sm:$0x1]  ;;  %s150_s14 = smov [#allocation6]  }
  0x15   :  { %s50_s7 = sshll.u32 %s149_s6, 4  ;;  %v34_v1 = vld [vmem:[#allocation2] sm:$0x1]  ;;  %s60_s0 = sshll.u32 %s150_s14, 4  ;;  %s51_s7 = int_to_ptr.vmem [resolvable:$true] %s50_s7  ;;  %s202_s0 = int_to_ptr.vmem [resolvable:$true] %s60_s0 }
  0x16   :  { %v36_v2 = vld [vmem:[%s236_s2] sm:$0x1]  ;;  %v35_v3 = vadd.f32 %v34_v1, %v33_v0  ;;  %s98_s1 = scalar_lea.vmem %s51_s7, 16  ;;  %s102_s15 = scalar_lea.vmem %s51_s7, 32 }
  0x17   :  { %v40_v4 = vld [vmem:[%s237_s3] sm:$0x1]  ;;  %p99_p8 = scmp.ne.s32.totalorder %s51_s7, %s98_s1  ;;  %p103_p9 = scmp.lt.s32.totalorder %s51_s7, %s51_s7 }
  0x18   :  { %vm37_vm0 = vcmp.gt.f32.partialorder %v35_v3, %v36_v2  ;;  %v41_v5 = vmul.f32 %v40_v4, %v35_v3  ;;  %p104_p10 = scmp.lt.s32.totalorder %s102_s15, %s98_s1 }
  0x19   :  { %v38_v6 = vsel %vm37_vm0, %v35_v3, 0.0 }
  0x1a   :  { %39 = vst [vmem:[#allocation5] sm:$0x1] %v38_v6  ;;  %v42_v7 = vsel %vm37_vm0, 0.0, %v41_v5  ;;  %p105_p11 = por %p104_p10, %p103_p9 }
  0x1b   :  { %43 = vst [vmem:[#allocation6] sm:$0x1] %v42_v7 }
  0x1c   :  { %p106_p12 = pnand %p105_p11, %p99_p8 }
  0x1e   :  { %109 = shalt.err (!%p106_p12)
}
  0x1f   :  { %s110_s16 = scalar_lea.hbm %s238_s4, 16 }
  0x20   :  { %p111_p13 = scmp.ne.s32.totalorder %s238_s4, %s110_s16  ;;  %p114_p0 = scmp.lt.u32.totalorder %s110_s16, %s238_s4 }
  0x22   :  { %p116_p1 = pnand %p114_p0, %p111_p13 }
  0x24   :  { %119 = shalt.err (!%p116_p1)
}
  0x25   :  { %53 = dma.vmem_to_hbm [thread:$0]  %s51_s7, 16, %s238_s4, [#allocation4]  }
  0x26   :  { %s120_s23 = scalar_lea.vmem %s202_s0, 16  ;;  %s124_s24 = scalar_lea.vmem %s202_s0, 32 }
  0x27   :  { %p121_p2 = scmp.ne.s32.totalorder %s202_s0, %s120_s23  ;;  %p125_p3 = scmp.lt.s32.totalorder %s202_s0, %s202_s0 }
  0x28   :  { %p126_p4 = scmp.lt.s32.totalorder %s124_s24, %s120_s23 }
  0x2a   :  { %p127_p5 = por %p126_p4, %p125_p3 }
  0x2c   :  { %p128_p6 = pnand %p127_p5, %p121_p2 }
  0x2e   :  { %131 = shalt.err (!%p128_p6)
}
  0x2f   :  { %s132_s27 = scalar_lea.hbm %s239_s5, 16 }
  0x30   :  { %p133_p7 = scmp.ne.s32.totalorder %s239_s5, %s132_s27  ;;  %p136_p8 = scmp.lt.u32.totalorder %s132_s27, %s239_s5 }
  0x32   :  { %p138_p9 = pnand %p136_p8, %p133_p7 }
  0x34   :  { %141 = shalt.err (!%p138_p9)
}
  0x35   :  { %63 = dma.vmem_to_hbm [thread:$0]  %s202_s0, 16, %s239_s5, [#allocation7]  }
  0x36   :  { %144 = dma.done.wait [#allocation4], 16  }
  0x37   :  { %145 = vsyncadd [#allocation4], 4294967280 }
  0x38   :  { %146 = dma.done.wait [#allocation7], 16  }
  0x39   :  { %147 = vsyncadd [#allocation7], 4294967280 }
  0x3a   :  { %70 = vsyncpa [#allocation3], 1 }
  0x3b   :  { %71 = vsyncpa [#allocation4], 1 }
  0x3c   :  { %72 = vsyncpa [#allocation7], 1 }

</bundles_post_ra>
